<compile_context>
chip_gen: v5e
topology: v5e:2x2
jax: 0.10.0
libtpu: 0.0.40
codegen_flags: <defaults>
</compile_context>

<pallas_src>
import math

import jax
import jax.numpy as jnp
from jax import lax
from jax.experimental import pallas as pl
from jax.experimental.pallas import tpu as pltpu


# ----------------------------------------------------------------------------
# Pallas kernel: fused (W @ patchesT) + bias + ReLU, lane-dense output
# ----------------------------------------------------------------------------
def _wxp_bias_relu_kernel(w_ref, b_ref, p_ref, o_ref):
    # w_ref: (Cout, Kpad) bf16, p_ref: (Kpad, tile_m) bf16, b_ref: (Cout, 1) f32
    acc = jnp.dot(w_ref[...], p_ref[...], preferred_element_type=jnp.float32)
    o_ref[...] = jnp.maximum(acc + b_ref[...], 0.0)


def _matmul_bias_relu_T(w2d, b, patchesT, *, min_tiles=2, max_tile_m=2048):
    """relu(w2d @ patchesT + b).

    w2d: (Cout, K) f32, b: (Cout,) f32, patchesT: (K, M) f32.
    Returns (Cout, M) f32.  bf16 MXU inputs, f32 accumulation.
    """
    Cout, K = w2d.shape
    M = patchesT.shape[1]

    # Pad contraction depth to the MXU-friendly 128.
    Kpad = pl.cdiv(K, 128) * 128

    # Large lane-dense tiles; keep >=2 grid steps when possible so both v7x
    # TensorCores get work, but cap the tile for VMEM headroom at scale.
    tile_m = max(128, pl.cdiv(pl.cdiv(M, min_tiles), 128) * 128)
    tile_m = min(tile_m, max_tile_m)
    num_tiles = pl.cdiv(M, tile_m)
    Mpad = num_tiles * tile_m

    w_p = jnp.pad(w2d.astype(jnp.bfloat16), ((0, 0), (0, Kpad - K)))
    p_p = jnp.pad(patchesT.astype(jnp.bfloat16), ((0, Kpad - K), (0, Mpad - M)))
    b2 = b.reshape(Cout, 1).astype(jnp.float32)

    out = pl.pallas_call(
        _wxp_bias_relu_kernel,
        out_shape=jax.ShapeDtypeStruct((Cout, Mpad), jnp.float32),
        grid=(num_tiles,),
        in_specs=[
            pl.BlockSpec((Cout, Kpad), lambda i: (0, 0)),   # weight resident
            pl.BlockSpec((Cout, 1), lambda i: (0, 0)),      # bias resident
            pl.BlockSpec((Kpad, tile_m), lambda i: (0, i)),  # streamed patches
        ],
        out_specs=pl.BlockSpec((Cout, tile_m), lambda i: (0, i)),
        compiler_params=pltpu.CompilerParams(
            dimension_semantics=("parallel",),
            vmem_limit_bytes=32 * 1024 * 1024,   # explicit budget, v7x-safe
        ),
    )(w_p, b2, p_p)
    return out[:, :M]


# ----------------------------------------------------------------------------
# im2col glue (plain JAX), transposed layout: (K, M) with M on the fast axis.
# K ordering is channel-major / kernel-position-minor, matching
# w.reshape(Cout, Cin*kd*kh*kw).
# ----------------------------------------------------------------------------
def _im2col_3d_T(x, ksize, stride, padding, *, channels_axis):
    """x: (N, C, D, H, W) if channels_axis==1, else (C, N, D, H, W).

    Returns (patchesT (C*kd*kh*kw, N*Do*Ho*Wo), (N, Do, Ho, Wo)).
    """
    kd, kh, kw = ksize
    sd, sh, sw = stride
    pd, ph, pw = padding
    x = jnp.pad(x, ((0, 0), (0, 0), (pd, pd), (ph, ph), (pw, pw)))
    if channels_axis == 1:
        N, C = x.shape[0], x.shape[1]
    else:
        C, N = x.shape[0], x.shape[1]
    D, H, W = x.shape[2], x.shape[3], x.shape[4]
    Do = (D - kd) // sd + 1
    Ho = (H - kh) // sh + 1
    Wo = (W - kw) // sw + 1

    cols = []
    for dz in range(kd):
        for dy in range(kh):
            for dx in range(kw):
                cols.append(
                    x[
                        :, :,
                        dz : dz + (Do - 1) * sd + 1 : sd,
                        dy : dy + (Ho - 1) * sh + 1 : sh,
                        dx : dx + (Wo - 1) * sw + 1 : sw,
                    ]
                )
    if channels_axis == 1:
        cols = jnp.stack(cols, axis=2)               # (N, C, kpos, Do, Ho, Wo)
        cols = cols.transpose(1, 2, 0, 3, 4, 5)      # (C, kpos, N, Do, Ho, Wo)
    else:
        cols = jnp.stack(cols, axis=1)               # (C, kpos, N, Do, Ho, Wo)
    patchesT = cols.reshape(C * kd * kh * kw, N * Do * Ho * Wo)
    return patchesT, (N, Do, Ho, Wo)


# ----------------------------------------------------------------------------
# ConvBlock forward (PyTorch Conv3d cross-correlation semantics)
# ----------------------------------------------------------------------------
def conv_block_forward(x, params):
    """x: (N, Cin, D, H, W) -> (N, Cout, D-2, H//2, W//2)."""
    w1, b1, w2, b2 = params
    N = x.shape[0]
    Cout = w1.shape[0]

    # conv1: kernel (3,3,3), stride (1,1,1), padding (0,1,1) + ReLU
    p1, (_, Do1, Ho1, Wo1) = _im2col_3d_T(
        x, (3, 3, 3), (1, 1, 1), (0, 1, 1), channels_axis=1)
    y1 = _matmul_bias_relu_T(w1.reshape(Cout, -1), b1, p1)   # (Cout, N*Do1*Ho1*Wo1)
    y1 = y1.reshape(Cout, N, Do1, Ho1, Wo1)                  # stay channels-first

    # conv2: kernel (1,3,3), stride (1,2,2), padding (0,1,1) + ReLU
    p2, (_, Do2, Ho2, Wo2) = _im2col_3d_T(
        y1, (1, 3, 3), (1, 2, 2), (0, 1, 1), channels_axis=0)
    y2 = _matmul_bias_relu_T(w2.reshape(Cout, -1), b2, p2)   # (Cout, N*Do2*Ho2*Wo2)
    y2 = y2.reshape(Cout, N, Do2, Ho2, Wo2).transpose(1, 0, 2, 3, 4)
    return y2


# ----------------------------------------------------------------------------
# Parameter init (deterministic orthogonal, like layer_init(std=sqrt(2), bias=0))
# ----------------------------------------------------------------------------
def orthogonal_init(key, shape, gain):
    rows = shape[0]
    cols = math.prod(shape[1:])
    a = jax.random.normal(key, (max(rows, cols), min(rows, cols)), jnp.float32)
    q, r = jnp.linalg.qr(a)
    q = q * jnp.sign(jnp.diagonal(r))
    if rows < cols:
        q = q.T
    return (gain * q[:rows, :cols]).reshape(shape).astype(jnp.float32)


def make_conv_block_params(key, in_channels, out_channels):
    k1, k2 = jax.random.split(key)
    gain = math.sqrt(2.0)
    w1 = orthogonal_init(k1, (out_channels, in_channels, 3, 3, 3), gain)
    b1 = jnp.zeros((out_channels,), jnp.float32)
    w2 = orthogonal_init(k2, (out_channels, out_channels, 1, 3, 3), gain)
    b2 = jnp.zeros((out_channels,), jnp.float32)
    return w1, b1, w2, b2


# ----------------------------------------------------------------------------
# Reference (pure XLA) mirroring the bf16 input rounding of the Pallas path
# ----------------------------------------------------------------------------
def _bf16_round(a):
    return a.astype(jnp.bfloat16).astype(jnp.float32)


def _ref_conv3d_relu(x, w, b, *, stride, padding):
    dn = lax.conv_dimension_numbers(x.shape, w.shape, ("NCDHW", "OIDHW", "NCDHW"))
    pad = [(p, p) for p in padding]
    y = lax.conv_general_dilated(
        _bf16_round(x), _bf16_round(w), window_strides=stride, padding=pad,
        dimension_numbers=dn, precision=lax.Precision.HIGHEST)
    y = y + b.reshape(1, -1, 1, 1, 1)
    return jnp.maximum(y, 0.0)


def _ref_forward(x, params):
    w1, b1, w2, b2 = params
    x = _ref_conv3d_relu(x, w1, b1, stride=(1, 1, 1), padding=(0, 1, 1))
    x = _ref_conv3d_relu(x, w2, b2, stride=(1, 2, 2), padding=(0, 1, 1))
    return x


if __name__ == "__main__":
    key = jax.random.PRNGKey(0)
    kx, kp = jax.random.split(key)

    # Shapes consistent with the module: N=2, Cin=4, Cout=8, time_dimension=7, H=W=16
    N, Cin, Cout, D, H, W = 2, 4, 8, 7, 16, 16
    x = jax.random.normal(kx, (N, Cin, D, H, W), jnp.float32)
    params = make_conv_block_params(kp, Cin, Cout)

    out = jax.block_until_ready(conv_block_forward(x, params))

    # Expected output shape: (2, 8, 5, 8, 8)
    assert out.shape == (N, Cout, D - 2, H // 2, W // 2), out.shape

    ref = jax.block_until_ready(_ref_forward(x, params))
    max_err = float(jnp.max(jnp.abs(out - ref)))
    assert jnp.allclose(out, ref, atol=2e-3, rtol=2e-3), max_err

    print("KERNEL_OK")
</pallas_src>

<mosaic_0001>
module attributes {stable_mosaic.version = 11 : i64} {
  func.func @_wxp_bias_relu_kernel(%arg0: i32, %arg1: memref<8x128xbf16, #tpu.memory_space<vmem>>, %arg2: memref<8x1xf32, #tpu.memory_space<vmem>>, %arg3: memref<128x1280xbf16, #tpu.memory_space<vmem>>, %arg4: memref<8x1280xf32, #tpu.memory_space<vmem>>) attributes {dimension_semantics = [#tpu.dimension_semantics<parallel>], iteration_bounds = array<i64: 2>, scalar_prefetch = 0 : i64, scratch_operands = 0 : i64, tpu.core_type = #tpu.core_type<tc>, window_params = [{pipeline_mode = #tpu.pipeline_mode<synchronous>, transform_indices = @transform_0, window_bounds = array<i64: 8, 128>}, {pipeline_mode = #tpu.pipeline_mode<synchronous>, transform_indices = @transform_1, window_bounds = array<i64: 8, 1>}, {transform_indices = @transform_2, window_bounds = array<i64: 128, 1280>}, {transform_indices = @transform_3, window_bounds = array<i64: 8, 1280>}]} {
    %c0 = arith.constant 0 : index
    %c0_0 = arith.constant 0 : index
    %0 = vector.load %arg1[%c0, %c0_0] : memref<8x128xbf16, #tpu.memory_space<vmem>>, vector<8x128xbf16>
    %c0_1 = arith.constant 0 : index
    %c0_2 = arith.constant 0 : index
    %1 = vector.load %arg3[%c0_1, %c0_2] : memref<128x1280xbf16, #tpu.memory_space<vmem>>, vector<128x1280xbf16>
    %cst = arith.constant dense<0.000000e+00> : vector<8x1280xf32>
    %2 = tpu.matmul %0, %1, %cst {dimension_numbers = #tpu.dot_dimension_numbers<[1], [0], [0], [1], [0, 0, 1, 1], [], []>} : vector<8x128xbf16>, vector<128x1280xbf16>, vector<8x1280xf32> -> vector<8x1280xf32>
    %c0_3 = arith.constant 0 : index
    %c0_4 = arith.constant 0 : index
    %3 = vector.load %arg2[%c0_3, %c0_4] : memref<8x1xf32, #tpu.memory_space<vmem>>, vector<8x1xf32>
    %4 = vector.broadcast %3 : vector<8x1xf32> to vector<8x1280xf32>
    %5 = arith.addf %2, %4 : vector<8x1280xf32>
    %cst_5 = arith.constant 0.000000e+00 : f32
    %6 = vector.broadcast %cst_5 : f32 to vector<8x1280xf32>
    %7 = arith.maximumf %5, %6 : vector<8x1280xf32>
    %c0_6 = arith.constant 0 : index
    %c0_7 = arith.constant 0 : index
    %8 = vector.load %arg4[%c0_6, %c0_7] : memref<8x1280xf32, #tpu.memory_space<vmem>>, vector<8x1280xf32>
    tpu.vector_store %arg4[%c0_6, %c0_7], %7 {strides = array<i32>} : memref<8x1280xf32, #tpu.memory_space<vmem>>, vector<8x1280xf32>,
    return
  }
  func.func @transform_0(%arg0: i32) -> (i32, i32) {
    %c0_i32 = arith.constant 0 : i32
    %c0_i32_0 = arith.constant 0 : i32
    %c0_i32_1 = arith.constant 0 : i32
    return %c0_i32, %c0_i32_0 : i32, i32
  }
  func.func @transform_1(%arg0: i32) -> (i32, i32) {
    %c0_i32 = arith.constant 0 : i32
    %c0_i32_0 = arith.constant 0 : i32
    %c0_i32_1 = arith.constant 0 : i32
    return %c0_i32, %c0_i32_0 : i32, i32
  }
  func.func @transform_2(%arg0: i32) -> (i32, i32) {
    %c0_i32 = arith.constant 0 : i32
    %c0_i32_0 = arith.constant 0 : i32
    return %c0_i32, %arg0 : i32, i32
  }
  func.func @transform_3(%arg0: i32) -> (i32, i32) {
    %c0_i32 = arith.constant 0 : i32
    %c0_i32_0 = arith.constant 0 : i32
    return %c0_i32, %arg0 : i32, i32
  }
}

</mosaic_0001>

<bundles_post_ra>
// kernel: tpu_custom_call.1
= control target key start
LH: loop header
LB: loop body
LE: loop exit
PB: predicated region body
PF: predicated region fallthrough
CT: control target
= control target key end

     0   :  { %8 = vsyncpa [#allocation3], 0  ;;  %s1816_s0 = inlined_call_operand.vmem [shape: bf16[8,128], index: 0, kind: input, shape index: {}]   ;;  %s1817_s1 = inlined_call_operand.vmem [shape: f32[8,1], index: 1, kind: input, shape index: {}]   ;;  %s1818_s2 = inlined_call_operand.hbm [shape: bf16[128,2560], index: 2, kind: input, shape index: {}]   ;;  %s1819_s3 = inlined_call_operand.hbm [shape: f32[8,2560], index: 3, kind: output, shape index: {}]  }
   0x1   :  { %10 = vsyncpa [#allocation3 + $0x1], 0 }
   0x2   :  { %11 = vsyncpa [#allocation4], 0 }
   0x3   :  { %13 = vsyncpa [#allocation4 + $0x1], 0  ;;  %s1503_s12 = smov 0   ;;  %s1505_s13 = smov 0  }
   0x4   :  { %s1507_s14 = smov 0   ;;  %s1509_s15 = smov 0  }
   0x5 LB: > { %s1524_s16 = sadd.s32 4294967295, %s1477_s15   ;;  %s917_s17 = sadd.s32 4294967294, %s1477_s15   ;;  %s1477_s15 = sphi %s1509_s15, %s1827_s15   ;;  %s1473_s14 = sphi %s1507_s14, %s1826_s14   ;;  %s1469_s13 = sphi %s1505_s13, %s1825_s13   ;;  %s1465_s12 = sphi %s1503_s12, %s1824_s12  }
   0x6   : > { %s1528_s18 = sadd.s32 1, %s1477_s15   ;;  %s68_s19 = sadd.s32 1, %s1473_s14 }
   0x7   : > { %s65_s20 = ssub.s32 %s1477_s15, %s1528_s18  ;;  %p75_p0 = scmp.ne.s32.totalorder %s1473_s14, %s1469_s13 }
   0x8   : > { %p66_p1 = scmp.eq.s32.totalorder %s65_s20, 0  ;;  %p76_p2 = scmp.eq.s32.totalorder %s1477_s15, 0 }
   0x9   : > { %p81_p3 = scmp.ne.s32.totalorder %s1469_s13, %s1465_s12  ;;  %p82_p4 = scmp.eq.s32.totalorder %s1524_s16, 0 }
   0xa   : > { %s1540_s21 = scalar_select %p66_p1, %s1473_s14, %s68_s19  }
   0xb   : > { %p77_p5 = por %p76_p2, %p75_p0  ;;  %p1542_p6 = por %p82_p4, %p81_p3 }
   0xc   : > { %p105_p7 = scmp.eq.s32.totalorder %s1524_s16, 1  ;;  %p111_p8 = scmp.eq.s32.totalorder %s917_s17, 1 }
   0xd   : > { %p919_p9 = scmp.ge.s32.totalorder %s1477_s15, 2  ;;  %p1342_p10 = scmp.lt.s32.totalorder %s1477_s15, 2 }
   0xe   : > { %p1549_p11 = por %p105_p7, %p75_p0  ;;  %p1553_p12 = por %p111_p8, %p81_p3 }
   0xf   : > { %s137_s25 = sand.u32 1, %s1473_s14   ;;  %s1245_s26 = smul.u32 40, %s1477_s15 }
  0x10   : > { %s1327_s27 = smul.u32 640, %s137_s25  ;;  %p1562_p13 = pnand %p1342_p10, %p77_p5 }
  0x11   : > { %s146_s30 = scalar_lea.hbm %s1818_s2, %s1245_s26  ;;  %p921_p0 = scmp.ge.s32.totalorder %s1477_s15, 1 }
  0x12   : > { %s147_s5 = sshll.u32 %s146_s30, 4  ;;  %s141_s6 = scalar_lea.vmem [#allocation2], %s1327_s27  ;;  %s148_s5 = int_to_ptr.hbm [resolvable:$true] %s147_s5 }
  0x13   : > { %s149_s7 = sshll.u32 %s141_s6, 4  ;;  %s138_s8 = scalar_lea.sflag [#allocation3], %s137_s25  ;;  %s150_s7 = int_to_ptr.vmem [resolvable:$true] %s149_s7 }
  0x14   : > { %s1381_s9 = sshra.s32 %s148_s5, 4  ;;  %p1385_p2 = pneg %p1562_p13  ;;  %s1382_s9 = int_to_ptr.hbm [resolvable:$true] %s1381_s9 }
  0x15   : > { %s1383_s10 = scalar_lea.hbm %s1382_s9, 640  ;;  %s1388_s19 = scalar_lea.hbm %s1818_s2, 1280 }
  0x16   : > { %p1384_p1 = scmp.ne.s32.totalorder %s1382_s9, %s1383_s10  ;;  %p1389_p5 = scmp.lt.s32.totalorder %s1382_s9, %s1818_s2 }
  0x17   : > { %p1390_p7 = scmp.lt.s32.totalorder %s1388_s19, %s1383_s10 }
  0x18   : > { %p1386_p3 = pnand %p1385_p2, %p1384_p1 }
  0x19   : > { %p1391_p8 = por %p1390_p7, %p1389_p5 }
  0x1a   : > { %p1387_p4 = pneg %p1386_p3 }
  0x1c   : > { %p1392_p10 = pnand %p1391_p8, %p1387_p4 }
  0x1e   : > { %1395 = shalt.err (!%p1392_p10)
}
  0x1f   : > { %s1479_s25 = smov 1280   ;;  %s1480_s27 = smov 640  }
  0x20   : > { %s1481_s28 = smov 40   ;;  %p157_p1 = scmp.lt.s32.totalorder %s1477_s15, 3 }
  0x21   : > { %1337 = dma.hbm_to_vmem [thread:$0]  (!%p1562_p13), %s148_s5, 10240, %s150_s7, %s138_s8, %s1479_s25, %s1480_s27, %s1481_s28  }
  0x22   : > { %p158_p2 = pnand %p921_p0, %p157_p1 }
  0x23   : > { %s1581_s29 = sand.u32 (!%p158_p2), 1, %s1469_s13  }
  0x24   : > { %161 = sbr.rel (%p158_p2) target bundleno = 275 (0x113), region = 32  ;;  %s164_s6 = scalar_lea.sflag (!%p158_p2), [#allocation3], %s1581_s29 }
  0x25   : > { %s1328_s30 = smul.u32 (!%p158_p2), 640, %s1581_s29 }
  0x27   : > { %s1585_s9 = scalar_lea.vmem (!%p158_p2), [#allocation2], %s1328_s30 }
  0x29   : > { %1456 = dma.done.wait (%p1542_p6), %s164_s6, 10240  }
  0x2a   : > { %1458 = vsyncadd (%p1542_p6), %s164_s6, 4294957056  ;;  %v1204_v0 = vld [vmem:[%s1585_s9 + $0x230] sm:$0xf]  ;;  %v1321_v1 = vld [vmem:[%s1585_s9 + $0x254] sm:$0xf0]  ;;  %s1329_s8 = smul.u32 80, %s1581_s29 }
  0x2b   : > { %v1316_v2 = vld [vmem:[%s1585_s9 + $0x234] sm:$0xf]  ;;  %v1205_v3 = vor.u32 %v1321_v1, %v1204_v0  ;;  %v1206_v4 = vld [vmem:[%s1585_s9 + $0x258] sm:$0xf0]  ;;  %v1164_v5 = vld [vmem:[%s1585_s9 + $0x1e0] sm:$0xf] }
  0x2c   : > { %v1311_v6 = vld [vmem:[%s1585_s9 + $0x204] sm:$0xf0]  ;;  %v1209_v7 = vor.u32 %v1316_v2, %v1206_v4  ;;  %v1306_v8 = vld [vmem:[%s1585_s9 + $0x1e4] sm:$0xf]  ;;  %v1166_v9 = vld [vmem:[%s1585_s9 + $0x208] sm:$0xf0] }
  0x2d   : > { %680 = vmatpush.bf16.msra.mxu0 %v1205_v3  ;;  %v1165_v10 = vor.u32 %v1311_v6, %v1164_v5  ;;  %v1169_v11 = vor.u32 %v1306_v8, %v1166_v9  ;;  %v1124_v12 = vld [vmem:[%s1585_s9 + $0x190] sm:$0xf]  ;;  %v1301_v13 = vld [vmem:[%s1585_s9 + $0x1b4] sm:$0xf0]  ;;  %v1296_v14 = vld [vmem:[%s1585_s9 + $0x194] sm:$0xf] }
  0x2e   : > { %693 = vmatpush.bf16.msra.mxu1 %v1209_v7  ;;  %v1126_v15 = vld [vmem:[%s1585_s9 + $0x1b8] sm:$0xf0]  ;;  %v1212_v16 = vld [vmem:[%s1585_s9 + $0x238] sm:$0xf]  ;;  %v1322_v17 = vld [vmem:[%s1585_s9 + $0x25c] sm:$0xf0]  ;;  %v1125_v21 = vor.u32 %v1301_v13, %v1124_v12 }
  0x2f   : > { %v1213_v18 = vor.u32 %v1322_v17, %v1212_v16  ;;  %v1317_v19 = vld [vmem:[%s1585_s9 + $0x23c] sm:$0xf]  ;;  %v1214_v20 = vld [vmem:[%s1585_s9 + $0x260] sm:$0xf0]  ;;  %v1084_v22 = vld [vmem:[%s1585_s9 + $0x140] sm:$0xf]  ;;  %v1129_v25 = vor.u32 %v1296_v14, %v1126_v15 }
  0x30   : > { %v1291_v23 = vld [vmem:[%s1585_s9 + $0x164] sm:$0xf0]  ;;  %v1217_v24 = vor.u32 %v1317_v19, %v1214_v20  ;;  %v1312_v27 = vld [vmem:[%s1585_s9 + $0x20c] sm:$0xf0]  ;;  %v1307_v28 = vld [vmem:[%s1585_s9 + $0x1ec] sm:$0xf] }
  0x31   : > { %681 = vmatpush.bf16.msra.mxu0 %v1165_v10  ;;  %706 = vmatpush.bf16.msra.mxu2 %v1213_v18  ;;  %v1172_v26 = vld [vmem:[%s1585_s9 + $0x1e8] sm:$0xf]  ;;  %v1286_v29 = vld [vmem:[%s1585_s9 + $0x144] sm:$0xf]  ;;  %v1086_v30 = vld [vmem:[%s1585_s9 + $0x168] sm:$0xf0]  ;;  %v1085_v35 = vor.u32 %v1291_v23, %v1084_v22 }
  0x32   : > { %694 = vmatpush.bf16.msra.mxu1 %v1169_v11  ;;  %719 = vmatpush.bf16.msra.mxu3 %v1217_v24  ;;  %v1173_v31 = vor.u32 %v1312_v27, %v1172_v26  ;;  %v1174_v32 = vld [vmem:[%s1585_s9 + $0x210] sm:$0xf0]  ;;  %v1132_v34 = vld [vmem:[%s1585_s9 + $0x198] sm:$0xf]  ;;  %v1302_v36 = vld [vmem:[%s1585_s9 + $0x1bc] sm:$0xf0]  ;;  %v1089_v39 = vor.u32 %v1286_v29, %v1086_v30 }
  0x33   : > { %v1177_v33 = vor.u32 %v1307_v28, %v1174_v32  ;;  %v1297_v37 = vld [vmem:[%s1585_s9 + $0x19c] sm:$0xf]  ;;  %v1134_v38 = vld [vmem:[%s1585_s9 + $0x1c0] sm:$0xf0]  ;;  %v1044_v40 = vld [vmem:[%s1585_s9 + $0xf0] sm:$0xf]  ;;  %v1133_v43 = vor.u32 %v1302_v36, %v1132_v34 }
  0x34   : > { %v1281_v41 = vld [vmem:[%s1585_s9 + $0x114] sm:$0xf0]  ;;  %v1276_v42 = vld [vmem:[%s1585_s9 + $0xf4] sm:$0xf]  ;;  %v1046_v44 = vld [vmem:[%s1585_s9 + $0x118] sm:$0xf0]  ;;  %v1137_v45 = vor.u32 %v1297_v37, %v1134_v38 }
  0x35   : > { %682 = vmatpush.bf16.msra.mxu0 %v1125_v21  ;;  %707 = vmatpush.bf16.msra.mxu2 %v1173_v31  ;;  %v1092_v46 = vld [vmem:[%s1585_s9 + $0x148] sm:$0xf]  ;;  %v1292_v47 = vld [vmem:[%s1585_s9 + $0x16c] sm:$0xf0]  ;;  %v1287_v48 = vld [vmem:[%s1585_s9 + $0x14c] sm:$0xf]  ;;  %v1045_v50 = vor.u32 %v1281_v41, %v1044_v40  ;;  %v1049_v51 = vor.u32 %v1276_v42, %v1046_v44 }
  0x36   : > { %695 = vmatpush.bf16.msra.mxu1 %v1129_v25  ;;  %720 = vmatpush.bf16.msra.mxu3 %v1177_v33  ;;  %v1094_v49 = vld [vmem:[%s1585_s9 + $0x170] sm:$0xf0]  ;;  %v1004_v52 = vld [vmem:[%s1585_s9 + $0xa0] sm:$0xf]  ;;  %v1271_v53 = vld [vmem:[%s1585_s9 + $0xc4] sm:$0xf0]  ;;  %v1093_v55 = vor.u32 %v1292_v47, %v1092_v46 }
  0x37   : > { %v1266_v54 = vld [vmem:[%s1585_s9 + $0xa4] sm:$0xf]  ;;  %v1006_v56 = vld [vmem:[%s1585_s9 + $0xc8] sm:$0xf0]  ;;  %v1097_v57 = vor.u32 %v1287_v48, %v1094_v49  ;;  %v1052_v58 = vld [vmem:[%s1585_s9 + $0xf8] sm:$0xf]  ;;  %v1005_v62 = vor.u32 %v1271_v53, %v1004_v52 }
  0x38   : > { %v1282_v59 = vld [vmem:[%s1585_s9 + $0x11c] sm:$0xf0]  ;;  %v1277_v60 = vld [vmem:[%s1585_s9 + $0xfc] sm:$0xf]  ;;  %v1054_v61 = vld [vmem:[%s1585_s9 + $0x120] sm:$0xf0]  ;;  %v1009_v63 = vor.u32 %v1266_v54, %v1006_v56 }
  0x39   : > { %683 = vmatpush.bf16.msra.mxu0 %v1085_v35  ;;  %708 = vmatpush.bf16.msra.mxu2 %v1133_v43  ;;  %v964_v0 = vld [vmem:[%s1585_s9 + $0x50] sm:$0xf]  ;;  %v1261_v1 = vld [vmem:[%s1585_s9 + $0x74] sm:$0xf0]  ;;  %v1256_v2 = vld [vmem:[%s1585_s9 + $0x54] sm:$0xf]  ;;  %v1053_v3 = vor.u32 %v1282_v59, %v1052_v58  ;;  %v1057_v5 = vor.u32 %v1277_v60, %v1054_v61 }
  0x3a   : > { %696 = vmatpush.bf16.msra.mxu1 %v1089_v39  ;;  %721 = vmatpush.bf16.msra.mxu3 %v1137_v45  ;;  %v966_v4 = vld [vmem:[%s1585_s9 + $0x78] sm:$0xf0]  ;;  %v1012_v6 = vld [vmem:[%s1585_s9 + $0xa8] sm:$0xf]  ;;  %v1272_v7 = vld [vmem:[%s1585_s9 + $0xcc] sm:$0xf0]  ;;  %v965_v10 = vor.u32 %v1261_v1, %v964_v0 }
  0x3b   : > { %v1267_v8 = vld [vmem:[%s1585_s9 + $0xac] sm:$0xf]  ;;  %v1014_v9 = vld [vmem:[%s1585_s9 + $0xd0] sm:$0xf0]  ;;  %v924_v11 = vld [vmem:[%s1585_s9] sm:$0xf]  ;;  %v969_v12 = vor.u32 %v1256_v2, %v966_v4  ;;  %v1013_v16 = vor.u32 %v1272_v7, %v1012_v6 }
  0x3c   : > { %v1251_v13 = vld [vmem:[%s1585_s9 + $0x24] sm:$0xf0]  ;;  %v1246_v14 = vld [vmem:[%s1585_s9 + $0x4] sm:$0xf]  ;;  %v926_v15 = vld [vmem:[%s1585_s9 + $0x28] sm:$0xf0]  ;;  %v1017_v20 = vor.u32 %v1267_v8, %v1014_v9 }
  0x3d   : > { %684 = vmatpush.bf16.msra.mxu0 %v1045_v50  ;;  %709 = vmatpush.bf16.msra.mxu2 %v1093_v55  ;;  %v1220_v17 = vld [vmem:[%s1585_s9 + $0x240] sm:$0xf]  ;;  %v1323_v18 = vld [vmem:[%s1585_s9 + $0x264] sm:$0xf0]  ;;  %v1318_v19 = vld [vmem:[%s1585_s9 + $0x244] sm:$0xf]  ;;  %v925_v24 = vor.u32 %v1251_v13, %v924_v11  ;;  %v929_v27 = vor.u32 %v1246_v14, %v926_v15 }
  0x3e   : > { %697 = vmatpush.bf16.msra.mxu1 %v1049_v51  ;;  %722 = vmatpush.bf16.msra.mxu3 %v1097_v57  ;;  %v1222_v21 = vld [vmem:[%s1585_s9 + $0x268] sm:$0xf0]  ;;  %v972_v22 = vld [vmem:[%s1585_s9 + $0x58] sm:$0xf]  ;;  %v1262_v23 = vld [vmem:[%s1585_s9 + $0x7c] sm:$0xf0]  ;;  %v1221_v28 = vor.u32 %v1323_v18, %v1220_v17 }
  0x3f   : > { %v1257_v25 = vld [vmem:[%s1585_s9 + $0x5c] sm:$0xf]  ;;  %v974_v26 = vld [vmem:[%s1585_s9 + $0x80] sm:$0xf0]  ;;  %v1180_v29 = vld [vmem:[%s1585_s9 + $0x1f0] sm:$0xf]  ;;  %v1225_v31 = vor.u32 %v1318_v19, %v1222_v21  ;;  %v973_v34 = vor.u32 %v1262_v23, %v972_v22 }
  0x40   : > { %v1313_v30 = vld [vmem:[%s1585_s9 + $0x214] sm:$0xf0]  ;;  %v1308_v32 = vld [vmem:[%s1585_s9 + $0x1f4] sm:$0xf]  ;;  %v1182_v33 = vld [vmem:[%s1585_s9 + $0x218] sm:$0xf0]  ;;  %v977_v36 = vor.u32 %v1257_v25, %v974_v26 }
  0x41   : > { %685 = vmatpush.bf16.msra.mxu0 %v1005_v62  ;;  %710 = vmatpush.bf16.msra.mxu2 %v1053_v3  ;;  %v932_v35 = vld [vmem:[%s1585_s9 + $0x8] sm:$0xf]  ;;  %v1252_v37 = vld [vmem:[%s1585_s9 + $0x2c] sm:$0xf0]  ;;  %v1247_v38 = vld [vmem:[%s1585_s9 + $0xc] sm:$0xf]  ;;  %v1181_v43 = vor.u32 %v1313_v30, %v1180_v29  ;;  %v1185_v46 = vor.u32 %v1308_v32, %v1182_v33 }
  0x42   : > { %698 = vmatpush.bf16.msra.mxu1 %v1009_v63  ;;  %723 = vmatpush.bf16.msra.mxu3 %v1057_v5  ;;  %v934_v39 = vld [vmem:[%s1585_s9 + $0x30] sm:$0xf0]  ;;  %v1228_v40 = vld [vmem:[%s1585_s9 + $0x248] sm:$0xf]  ;;  %v1324_v41 = vld [vmem:[%s1585_s9 + $0x26c] sm:$0xf0]  ;;  %v933_v49 = vor.u32 %v1252_v37, %v932_v35 }
  0x43   : > { %v1668_v42 = vld [vmem:[%s1816_s0] sm:$0xf]  ;;  %v1319_v44 = vld [vmem:[%s1585_s9 + $0x24c] sm:$0xf]  ;;  %v1230_v45 = vld [vmem:[%s1585_s9 + $0x270] sm:$0xf0]  ;;  %v937_v52 = vor.u32 %v1247_v38, %v934_v39  ;;  %v1229_v53 = vor.u32 %v1324_v41, %v1228_v40 }
  0x44   : > { %v1140_v47 = vld [vmem:[%s1585_s9 + $0x1a0] sm:$0xf]  ;;  %v1303_v48 = vld [vmem:[%s1585_s9 + $0x1c4] sm:$0xf0]  ;;  %v1298_v50 = vld [vmem:[%s1585_s9 + $0x1a4] sm:$0xf]  ;;  %v1233_v54 = vor.u32 %v1319_v44, %v1230_v45 }
  0x45   : > { %686 = vmatpush.bf16.msra.mxu0 %v965_v10  ;;  %711 = vmatpush.bf16.msra.mxu2 %v1013_v16  ;;  %v1142_v51 = vld [vmem:[%s1585_s9 + $0x1c8] sm:$0xf0]  ;;  %v1188_v55 = vld [vmem:[%s1585_s9 + $0x1f8] sm:$0xf]  ;;  %v1314_v56 = vld [vmem:[%s1585_s9 + $0x21c] sm:$0xf0]  ;;  %v1141_v57 = vor.u32 %v1303_v48, %v1140_v47 }
  0x46   : > { %699 = vmatpush.bf16.msra.mxu1 %v969_v12  ;;  %724 = vmatpush.bf16.msra.mxu3 %v1017_v20  ;;  %v1309_v58 = vld [vmem:[%s1585_s9 + $0x1fc] sm:$0xf]  ;;  %v1190_v59 = vld [vmem:[%s1585_s9 + $0x220] sm:$0xf0]  ;;  %v1145_v60 = vor.u32 %v1298_v50, %v1142_v51  ;;  %v1100_v61 = vld [vmem:[%s1585_s9 + $0x150] sm:$0xf]  ;;  %v1189_v1 = vor.u32 %v1314_v56, %v1188_v55 }
  0x47   : > { %v1293_v62 = vld [vmem:[%s1585_s9 + $0x174] sm:$0xf0]  ;;  %v1288_v63 = vld [vmem:[%s1585_s9 + $0x154] sm:$0xf]  ;;  %v1102_v0 = vld [vmem:[%s1585_s9 + $0x178] sm:$0xf0]  ;;  %v1193_v2 = vor.u32 %v1309_v58, %v1190_v59 }
  0x48   : > { %v1148_v3 = vld [vmem:[%s1585_s9 + $0x1a8] sm:$0xf]  ;;  %v1304_v4 = vld [vmem:[%s1585_s9 + $0x1cc] sm:$0xf0]  ;;  %v1101_v5 = vor.u32 %v1293_v62, %v1100_v61  ;;  %v1299_v6 = vld [vmem:[%s1585_s9 + $0x1ac] sm:$0xf]  ;;  %v1105_v8 = vor.u32 %v1288_v63, %v1102_v0 }
  0x49   : > { %687 = vmatpush.bf16.msra.mxu0 %v925_v24  ;;  %712 = vmatpush.bf16.msra.mxu2 %v973_v34  ;;  %v1150_v7 = vld [vmem:[%s1585_s9 + $0x1d0] sm:$0xf0]  ;;  %v1060_v9 = vld [vmem:[%s1585_s9 + $0x100] sm:$0xf]  ;;  %v1283_v10 = vld [vmem:[%s1585_s9 + $0x124] sm:$0xf0]  ;;  %v1149_v13 = vor.u32 %v1304_v4, %v1148_v3 }
  0x4a   : > { %700 = vmatpush.bf16.msra.mxu1 %v929_v27  ;;  %725 = vmatpush.bf16.msra.mxu3 %v977_v36  ;;  %v1278_v11 = vld [vmem:[%s1585_s9 + $0x104] sm:$0xf]  ;;  %v1062_v12 = vld [vmem:[%s1585_s9 + $0x128] sm:$0xf0]  ;;  %v1153_v14 = vor.u32 %v1299_v6, %v1150_v7  ;;  %v1108_v15 = vld [vmem:[%s1585_s9 + $0x158] sm:$0xf]  ;;  %v1061_v17 = vor.u32 %v1283_v10, %v1060_v9 }
  0x4b   : > { %v1294_v16 = vld [vmem:[%s1585_s9 + $0x17c] sm:$0xf0]  ;;  %v1289_v18 = vld [vmem:[%s1585_s9 + $0x15c] sm:$0xf]  ;;  %v1110_v19 = vld [vmem:[%s1585_s9 + $0x180] sm:$0xf0]  ;;  %v1065_v21 = vor.u32 %v1278_v11, %v1062_v12 }
  0x4c   : > { %688 = vmatmul.bf16.vlgmr.msra.gmra.mxu0 %v1668_v42  ;;  %v274_v20 = vld [vmem:[%s1817_s1] sm:$0xff]  ;;  %v1020_v22 = vld [vmem:[%s1585_s9 + $0xb0] sm:$0xf]  ;;  %v1273_v23 = vld [vmem:[%s1585_s9 + $0xd4] sm:$0xf0]  ;;  %v1482_v24 = vmov 0   ;;  %v1109_v27 = vor.u32 %v1294_v16, %v1108_v15 }
  0x4d   : > { %732 = vmatpush.bf16.msrb.mxu0 %v1221_v28  ;;  %701 = vmatmul.bf16.vlgmr.msra.gmra.mxu1 %v1668_v42  ;;  %v1268_v25 = vld [vmem:[%s1585_s9 + $0xb4] sm:$0xf]  ;;  %v1022_v26 = vld [vmem:[%s1585_s9 + $0xd8] sm:$0xf0]  ;;  %v1113_v28 = vor.u32 %v1289_v18, %v1110_v19  ;;  %v1068_v29 = vld [vmem:[%s1585_s9 + $0x108] sm:$0xf] }
  0x4e   : > { %745 = vmatpush.bf16.msrb.mxu1 %v1225_v31  ;;  %713 = vmatpush.bf16.msra.mxu2 %v933_v49  ;;  %v1284_v30 = vld [vmem:[%s1585_s9 + $0x12c] sm:$0xf0]  ;;  %v1021_v31 = vor.u32 %v1273_v23, %v1020_v22  ;;  %v1279_v32 = vld [vmem:[%s1585_s9 + $0x10c] sm:$0xf]  ;;  %v1070_v33 = vld [vmem:[%s1585_s9 + $0x130] sm:$0xf0]  ;;  %v1025_v34 = vor.u32 %v1268_v25, %v1022_v26 }
  0x4f   : > { %726 = vmatpush.bf16.msra.mxu3 %v937_v52  ;;  %1380 = vset.pattern.permute.xlu0 %v1482_v24  ;;  %v980_v35 = vld [vmem:[%s1585_s9 + $0x60] sm:$0xf]  ;;  %v1263_v36 = vld [vmem:[%s1585_s9 + $0x84] sm:$0xf0]  ;;  %v1258_v37 = vld [vmem:[%s1585_s9 + $0x64] sm:$0xf]  ;;  %v1069_v39 = vor.u32 %v1284_v30, %v1068_v29  ;;  %v1073_v40 = vor.u32 %v1279_v32, %v1070_v33 }
  0x50   : > { %277 = vperm.xlu0 %1380, %v274_v20   ;;  %v982_v38 = vld [vmem:[%s1585_s9 + $0x88] sm:$0xf0]  ;;  %v1028_v41 = vld [vmem:[%s1585_s9 + $0xb8] sm:$0xf]  ;;  %v981_v44 = vor.u32 %v1263_v36, %v980_v35  ;;  %v940_v45 = vld [vmem:[%s1585_s9 + $0x10] sm:$0xf] }
  0x51   : > { %733 = vmatpush.bf16.msrb.mxu0 %v1181_v43  ;;  %714 = vmatmul.bf16.vlgmr.msra.gmra.mxu2 %v1668_v42  ;;  %v1274_v43 = vld [vmem:[%s1585_s9 + $0xdc] sm:$0xf0]  ;;  %v1030_v47 = vld [vmem:[%s1585_s9 + $0xe0] sm:$0xf0]  ;;  %v985_v48 = vor.u32 %v1258_v37, %v982_v38  ;;  %v1253_v49 = vld [vmem:[%s1585_s9 + $0x34] sm:$0xf0] }
  0x52   : > { %746 = vmatpush.bf16.msrb.mxu1 %v1185_v46  ;;  %758 = vmatpush.bf16.msrb.mxu2 %v1229_v53  ;;  %v1269_v46 = vld [vmem:[%s1585_s9 + $0xbc] sm:$0xf]  ;;  %v1248_v50 = vld [vmem:[%s1585_s9 + $0x14] sm:$0xf]  ;;  %v1236_v52 = vld [vmem:[%s1585_s9 + $0x250] sm:$0xf]  ;;  %v1029_v55 = vor.u32 %v1274_v43, %v1028_v41 }
  0x53   : > { %771 = vmatpush.bf16.msrb.mxu3 %v1233_v54  ;;  %v942_v51 = vld [vmem:[%s1585_s9 + $0x38] sm:$0xf0]  ;;  %v1325_v53 = vld [vmem:[%s1585_s9 + $0x274] sm:$0xf0]  ;;  %v1320_v54 = vld [vmem:[%s1585_s9 + $0x254] sm:$0xf] }
  0x54   : > { %727 = vmatmul.bf16.vlgmr.msra.gmra.mxu3 %v1668_v42  ;;  %v1238_v56 = vld [vmem:[%s1585_s9 + $0x278] sm:$0xf0]  ;;  %v988_v58 = vld [vmem:[%s1585_s9 + $0x68] sm:$0xf]  ;;  %v1264_v59 = vld [vmem:[%s1585_s9 + $0x8c] sm:$0xf0]  ;;  %v945_v63 = vor.u32 %v1248_v50, %v942_v51  ;;  %v1237_v0 = vor.u32 %v1325_v53, %v1236_v52 }
  0x55   : > { %734 = vmatpush.bf16.msrb.mxu0 %v1141_v57  ;;  %v1033_v57 = vor.u32 %v1269_v46, %v1030_v47  ;;  %v1259_v61 = vld [vmem:[%s1585_s9 + $0x6c] sm:$0xf]  ;;  %v990_v62 = vld [vmem:[%s1585_s9 + $0x90] sm:$0xf0]  ;;  %v1315_v3 = vld [vmem:[%s1585_s9 + $0x224] sm:$0xf0] }
  0x56   : > { %747 = vmatpush.bf16.msrb.mxu1 %v1145_v60  ;;  %759 = vmatpush.bf16.msrb.mxu2 %v1189_v1  ;;  %v941_v60 = vor.u32 %v1253_v49, %v940_v45  ;;  %v1241_v1 = vor.u32 %v1320_v54, %v1238_v56  ;;  %v1310_v4 = vld [vmem:[%s1585_s9 + $0x204] sm:$0xf]  ;;  %v1198_v6 = vld [vmem:[%s1585_s9 + $0x228] sm:$0xf0]  ;;  %v993_v7 = vor.u32 %v1259_v61, %v990_v62  ;;  %v1254_v9 = vld [vmem:[%s1585_s9 + $0x3c] sm:$0xf0] }
  0x57   : > { %772 = vmatpush.bf16.msrb.mxu3 %v1193_v2  ;;  %v1196_v2 = vld [vmem:[%s1585_s9 + $0x200] sm:$0xf]  ;;  %v1249_v10 = vld [vmem:[%s1585_s9 + $0x1c] sm:$0xf]  ;;  %v950_v11 = vld [vmem:[%s1585_s9 + $0x40] sm:$0xf0] }
  0x58   : > { %v1197_v12 = vor.u32 %v1315_v3, %v1196_v2  ;;  %v1305_v15 = vld [vmem:[%s1585_s9 + $0x1d4] sm:$0xf0]  ;;  %v1158_v18 = vld [vmem:[%s1585_s9 + $0x1d8] sm:$0xf0]  ;;  %v953_v19 = vor.u32 %v1249_v10, %v950_v11  ;;  %v1116_v22 = vld [vmem:[%s1585_s9 + $0x160] sm:$0xf] }
  0x59   : > { %735 = vmatpush.bf16.msrb.mxu0 %v1101_v5  ;;  %v989_v5 = vor.u32 %v1264_v59, %v988_v58  ;;  %v1295_v23 = vld [vmem:[%s1585_s9 + $0x184] sm:$0xf0]  ;;  %v1290_v24 = vld [vmem:[%s1585_s9 + $0x164] sm:$0xf]  ;;  %v1118_v25 = vld [vmem:[%s1585_s9 + $0x188] sm:$0xf0] }
  0x5a   : > { %748 = vmatpush.bf16.msrb.mxu1 %v1105_v8  ;;  %760 = vmatpush.bf16.msrb.mxu2 %v1149_v13  ;;  %v948_v8 = vld [vmem:[%s1585_s9 + $0x18] sm:$0xf]  ;;  %v1201_v13 = vor.u32 %v1310_v4, %v1198_v6  ;;  %v1117_v26 = vor.u32 %v1295_v23, %v1116_v22  ;;  %v1280_v30 = vld [vmem:[%s1585_s9 + $0x114] sm:$0xf]  ;;  %v1275_v35 = vld [vmem:[%s1585_s9 + $0xe4] sm:$0xf0] }
  0x5b   : > { %773 = vmatpush.bf16.msrb.mxu3 %v1153_v14  ;;  %v1156_v14 = vld [vmem:[%s1585_s9 + $0x1b0] sm:$0xf]  ;;  %v949_v16 = vor.u32 %v1254_v9, %v948_v8  ;;  %v1285_v29 = vld [vmem:[%s1585_s9 + $0x134] sm:$0xf0]  ;;  %v1270_v36 = vld [vmem:[%s1585_s9 + $0xc4] sm:$0xf] }
  0x5c   : > { %v1157_v20 = vor.u32 %v1305_v15, %v1156_v14  ;;  %v1038_v37 = vld [vmem:[%s1585_s9 + $0xe8] sm:$0xf0]  ;;  %v1265_v41 = vld [vmem:[%s1585_s9 + $0x94] sm:$0xf0]  ;;  %v1260_v43 = vld [vmem:[%s1585_s9 + $0x74] sm:$0xf] }
  0x5d   : > { %736 = vmatpush.bf16.msrb.mxu0 %v1061_v17  ;;  %v1300_v17 = vld [vmem:[%s1585_s9 + $0x1b4] sm:$0xf]  ;;  %v956_v47 = vld [vmem:[%s1585_s9 + $0x20] sm:$0xf]  ;;  %v1250_v49 = vld [vmem:[%s1585_s9 + $0x24] sm:$0xf] }
  0x5e   : > { %749 = vmatpush.bf16.msrb.mxu1 %v1065_v21  ;;  %761 = vmatpush.bf16.msrb.mxu2 %v1109_v27  ;;  %v1161_v21 = vor.u32 %v1300_v17, %v1158_v18  ;;  %v1121_v27 = vor.u32 %v1290_v24, %v1118_v25  ;;  %v958_v50 = vld [vmem:[%s1585_s9 + $0x48] sm:$0xf0]  ;;  %s1770_s10 = scalar_lea.vmem [#allocation5], %s1329_s8  ;;  %s1326_s11 = smul.u32 80, %s1524_s16 }
  0x5f   : > { %774 = vmatpush.bf16.msrb.mxu3 %v1113_v28  ;;  %v1076_v28 = vld [vmem:[%s1585_s9 + $0x110] sm:$0xf]  ;;  %v961_v52 = vor.u32 %v1250_v49, %v958_v50  ;;  %s844_s26 = sshll.u32 %s1770_s10, 4  ;;  %s831_s27 = scalar_lea.sflag [#allocation4], %s1581_s29  ;;  %s845_s26 = int_to_ptr.vmem [resolvable:$true] %s844_s26 }
  0x60   : > { %v1077_v32 = vor.u32 %v1285_v29, %v1076_v28  ;;  %s842_s20 = scalar_lea.hbm %s1819_s3, %s1326_s11 }
  0x61   : > { %737 = vmatpush.bf16.msrb.mxu0 %v1021_v31  ;;  %v1078_v31 = vld [vmem:[%s1585_s9 + $0x138] sm:$0xf0]  ;;  %s846_s25 = sshll.u32 %s842_s20, 4  ;;  %s847_s25 = int_to_ptr.hbm [resolvable:$true] %s846_s25 }
  0x62   : > { %750 = vmatpush.bf16.msrb.mxu1 %v1025_v34  ;;  %762 = vmatpush.bf16.msrb.mxu2 %v1069_v39  ;;  %v1081_v33 = vor.u32 %v1280_v30, %v1078_v31  ;;  %v1036_v34 = vld [vmem:[%s1585_s9 + $0xc0] sm:$0xf]  ;;  %v1041_v39 = vor.u32 %v1270_v36, %v1038_v37  ;;  %s1425_s28 = sshra.s32 %s847_s25, 4  ;;  %s1426_s28 = int_to_ptr.hbm [resolvable:$true] %s1425_s28 }
  0x63   : > { %775 = vmatpush.bf16.msrb.mxu3 %v1073_v40  ;;  %v1037_v38 = vor.u32 %v1275_v35, %v1036_v34  ;;  %v996_v40 = vld [vmem:[%s1585_s9 + $0x70] sm:$0xf]  ;;  %s1427_s16 = scalar_lea.hbm %s1426_s28, 80  ;;  %p1432_p3 = scmp.lt.s32.totalorder %s1426_s28, %s1819_s3 }
  0x64   : > { %v997_v45 = vor.u32 %v1265_v41, %v996_v40  ;;  %p1428_p6 = scmp.ne.s32.totalorder %s1426_s28, %s1427_s16 }
  0x65   : > { %738 = vmatpush.bf16.msrb.mxu0 %v981_v44  ;;  %v998_v44 = vld [vmem:[%s1585_s9 + $0x98] sm:$0xf0] }
  0x66   : > { %751 = vmatpush.bf16.msrb.mxu1 %v985_v48  ;;  %763 = vmatpush.bf16.msrb.mxu2 %v1029_v55  ;;  %v1001_v46 = vor.u32 %v1260_v43, %v998_v44  ;;  %v1255_v48 = vld [vmem:[%s1585_s9 + $0x44] sm:$0xf0]  ;;  %p1429_p13 = pnand %p1428_p6, %p1549_p11  ;;  %s1431_s9 = scalar_lea.hbm %s1819_s3, 160 }
  0x67   : > { %776 = vmatpush.bf16.msrb.mxu3 %v1033_v57  ;;  %v957_v51 = vor.u32 %v1255_v48, %v956_v47  ;;  %p1433_p4 = scmp.lt.s32.totalorder %s1431_s9, %s1427_s16 }
  0x68   : > { %p1430_p0 = pneg %p1429_p13 }
  0x69   : > { %739 = vmatpush.bf16.msrb.mxu0 %v941_v60  ;;  %p1434_p5 = por %p1433_p4, %p1432_p3 }
  0x6a   : > { %752 = vmatpush.bf16.msrb.mxu1 %v945_v63  ;;  %764 = vmatpush.bf16.msrb.mxu2 %v989_v5 }
  0x6b   : > { %777 = vmatpush.bf16.msrb.mxu3 %v993_v7  ;;  %p1435_p7 = pnand %p1434_p5, %p1430_p0 }
  0x6c   : > { %740 = vmatmul.bf16.vlgmr.msrb.gmra.mxu0 %v1668_v42 }
  0x6d   : > { %784 = vmatpush.bf16.msra.mxu0 %v1237_v0  ;;  %753 = vmatmul.bf16.vlgmr.msrb.gmra.mxu1 %v1668_v42 }
  0x6e   : > { %797 = vmatpush.bf16.msra.mxu1 %v1241_v1  ;;  %765 = vmatpush.bf16.msrb.mxu2 %v949_v16 }
  0x6f   : > { %778 = vmatpush.bf16.msrb.mxu3 %v953_v19 }
  0x71   : > { %785 = vmatpush.bf16.msra.mxu0 %v1197_v12  ;;  %766 = vmatmul.bf16.vlgmr.msrb.gmra.mxu2 %v1668_v42 }
  0x72   : > { %798 = vmatpush.bf16.msra.mxu1 %v1201_v13  ;;  %779 = vmatmul.bf16.vlgmr.msrb.gmra.mxu3 %v1668_v42 }
  0x75   : > { %786 = vmatpush.bf16.msra.mxu0 %v1157_v20 }
  0x76   : > { %799 = vmatpush.bf16.msra.mxu1 %v1161_v21 }
  0x79   : > { %787 = vmatpush.bf16.msra.mxu0 %v1117_v26 }
  0x7a   : > { %800 = vmatpush.bf16.msra.mxu1 %v1121_v27 }
  0x7d   : > { %788 = vmatpush.bf16.msra.mxu0 %v1077_v32 }
  0x7e   : > { %801 = vmatpush.bf16.msra.mxu1 %v1081_v33 }
  0x81   : > { %789 = vmatpush.bf16.msra.mxu0 %v1037_v38 }
  0x82   : > { %802 = vmatpush.bf16.msra.mxu1 %v1041_v39 }
  0x85   : > { %790 = vmatpush.bf16.msra.mxu0 %v997_v45 }
  0x86   : > { %803 = vmatpush.bf16.msra.mxu1 %v1001_v46 }
  0x89   : > { %791 = vmatpush.bf16.msra.mxu0 %v957_v51 }
  0x8a   : > { %804 = vmatpush.bf16.msra.mxu1 %v961_v52 }
  0x8c   : > { %792 = vmatmul.bf16.vlgmr.msra.gmra.mxu0 %v1668_v42 }
  0x8d   : > { %805 = vmatmul.bf16.vlgmr.msra.gmra.mxu1 %v1668_v42 }
  0xc2   : > { %v278_v55 = vpop.permute.xlu0 %277 }
  0xc9   : > { %v689_v53 = vpop.f32.mrf.mxu0 }
  0xca   : > { %v702_v54 = vpop.f32.mrf.mxu1  ;;  %v690_v56 = vadd.f32 %v689_v53, %v278_v55 }
  0xcb   : > { %v703_v57 = vadd.f32 %v702_v54, %v278_v55 }
  0xcc   : > { %v810_v58 = vmax.f32 %v690_v56, 0.0 }
  0xcd   : > { %v811_v59 = vmax.f32 %v703_v57, 0.0 }
  0xce   : > { %820 = vst [vmem:[%s1770_s10] sm:$0xff] %v810_v58 }
  0xcf   : > { %821 = vst [vmem:[%s1770_s10 + $0x8] sm:$0xff] %v811_v59 }
  0xd1   : > { %v691_v60 = vpop.f32.mrf.mxu0 }
  0xd2   : > { %v704_v61 = vpop.f32.mrf.mxu1 }
  0xd4   : > { %v715_v62 = vpop.f32.mrf.mxu2 }
  0xd5   : > { %v716_v42 = vadd.f32 %v715_v62, %v278_v55 }
  0xd7   : > { %v728_v63 = vpop.f32.mrf.mxu3  ;;  %v812_v1 = vmax.f32 %v716_v42, 0.0 }
  0xd8   : > { %v729_v0 = vadd.f32 %v728_v63, %v278_v55 }
  0xd9   : > { %822 = vst [vmem:[%s1770_s10 + $0x10] sm:$0xff] %v812_v1 }
  0xda   : > { %v813_v2 = vmax.f32 %v729_v0, 0.0 }
  0xdc   : > { %823 = vst [vmem:[%s1770_s10 + $0x18] sm:$0xff] %v813_v2  ;;  %v717_v3 = vpop.f32.mrf.mxu2 }
  0xdf   : > { %v730_v4 = vpop.f32.mrf.mxu3 }
  0xe9   : > { %v741_v5 = vpop.f32.mrf.mxu0 }
  0xea   : > { %v742_v6 = vadd.f32 %v741_v5, %v278_v55  ;;  %v754_v7 = vpop.f32.mrf.mxu1 }
  0xeb   : > { %v755_v8 = vadd.f32 %v754_v7, %v278_v55 }
  0xec   : > { %v814_v9 = vmax.f32 %v742_v6, 0.0 }
  0xed   : > { %v815_v10 = vmax.f32 %v755_v8, 0.0 }
  0xee   : > { %824 = vst [vmem:[%s1770_s10 + $0x20] sm:$0xff] %v814_v9 }
  0xef   : > { %825 = vst [vmem:[%s1770_s10 + $0x28] sm:$0xff] %v815_v10 }
  0xf1   : > { %v743_v11 = vpop.f32.mrf.mxu0 }
  0xf2   : > { %v756_v12 = vpop.f32.mrf.mxu1 }
  0xf4   : > { %v767_v13 = vpop.f32.mrf.mxu2 }
  0xf5   : > { %v768_v14 = vadd.f32 %v767_v13, %v278_v55  ;;  %v780_v15 = vpop.f32.mrf.mxu3 }
  0xf6   : > { %v781_v16 = vadd.f32 %v780_v15, %v278_v55 }
  0xf7   : > { %v816_v17 = vmax.f32 %v768_v14, 0.0 }
  0xf8   : > { %v817_v18 = vmax.f32 %v781_v16, 0.0 }
  0xf9   : > { %826 = vst [vmem:[%s1770_s10 + $0x30] sm:$0xff] %v816_v17 }
  0xfa   : > { %827 = vst [vmem:[%s1770_s10 + $0x38] sm:$0xff] %v817_v18 }
  0xfc   : > { %v769_v19 = vpop.f32.mrf.mxu2 }
  0xfd   : > { %v782_v20 = vpop.f32.mrf.mxu3 }
 0x109   : > { %v793_v21 = vpop.f32.mrf.mxu0 }
 0x10a   : > { %v794_v22 = vadd.f32 %v793_v21, %v278_v55  ;;  %v806_v23 = vpop.f32.mrf.mxu1 }
 0x10b   : > { %v807_v24 = vadd.f32 %v806_v23, %v278_v55 }
 0x10c   : > { %v818_v25 = vmax.f32 %v794_v22, 0.0 }
 0x10d   : > { %v819_v26 = vmax.f32 %v807_v24, 0.0 }
 0x10e   : > { %828 = vst [vmem:[%s1770_s10 + $0x40] sm:$0xff] %v818_v25 }
 0x10f   : > { %829 = vst [vmem:[%s1770_s10 + $0x48] sm:$0xff] %v819_v26 }
 0x110   : > { %1438 = shalt.err (!%p1435_p7)
}
 0x111   : > { %1332 = dma.vmem_to_hbm [thread:$0]  (%p1549_p11), %s845_s26, 1280, %s847_s25, %s831_s27   ;;  %v795_v27 = vpop.f32.mrf.mxu0 }
 0x112   : > { %v808_v28 = vpop.f32.mrf.mxu1 }
 0x113 PF: > { %s858_s29 = sand.u32 1, %s1465_s12   ;;  %p1339_p8 = pnand %p919_p9, %p1553_p12 }
 0x114   : > { %s859_s5 = scalar_lea.sflag [#allocation4], %s858_s29 }
 0x115   : > { %p1340_p10 = pneg %p1339_p8 }
 0x117   : > { %1460 = dma.done.wait (%p1340_p10), %s859_s5, 1280  }
 0x118   : > { %1462 = vsyncadd (%p1340_p10), %s859_s5, 4294966016  ;;  %p16_p11 = scmp.ge.s32.totalorder %s1528_s18, 4   ;;  %s1824_s12 = smov %s1469_s13 }
 0x119   : > { %s1825_s13 = smov %s1473_s14  ;;  %s1826_s14 = smov %s1540_s21 }
 0x11a   : > { %s1827_s15 = smov %s1528_s18  ;;  %18 = sbr.rel (!%p16_p11) target bundleno = 5 (0x5), region = 77 }
 0x11f   :  { %865 = vsyncpa [#allocation3], 1 }
 0x120   :  { %867 = vsyncpa [#allocation3 + $0x1], 1 }
 0x121   :  { %868 = vsyncpa [#allocation4], 1 }
 0x122   :  { %870 = vsyncpa [#allocation4 + $0x1], 1 }

</bundles_post_ra>
